<compile_context>
chip_gen: v7x
topology: tpu7x:2x2x1
jax: 0.10.0
libtpu: 0.0.40
codegen_flags: <defaults>
</compile_context>

<pallas_src>
import functools

import jax
import jax.numpy as jnp
import numpy as np
from jax.experimental import pallas as pl
from jax.experimental.pallas import tpu as pltpu


# -----------------------------------------------------------------------------
# Fused kernel: one image PAIR per grid step (all lane widths are per-pair).
#
#   x1_ref : (1, H1, 2*Cin*W1)      encoder feature, (c,w) lanes, 2 images packed
#   x2_ref : (1, H2, c2w)           skip connection, 2 images packed
#   m_ref  : (2*Cin*W1, 2*cupw)     ConvTranspose-as-matmul, cols = [even | odd]
#   p_ref  : (2*H1, 2*H1)           row permutation [even-rows; odd-rows] -> natural
#   wb1_ref: (3, c2w+cupw, cow)     banded conv1 weights (per ky), BN1 scale folded
#   wb2_ref: (3, cow, cow)          banded conv2 weights (per ky), BN2 scale folded
#   aff_ref: (3, Lmax) f32          rows: masked up-bias / BN1 shift / BN2 shift
#   o_ref  : (1, H2, cow) f32
#   xp1    : (H2+2, c2w+cupw) bf16  cat([x2, pad(up(x1))]) with 3x3 halo rows
#   xp2    : (H2+2, cow) bf16       conv1 output with halo rows
# -----------------------------------------------------------------------------
def _up_fused_kernel(x1_ref, x2_ref, m_ref, p_ref, wb1_ref, wb2_ref, aff_ref,
                     o_ref, xp1, xp2, *, H1, H2, off_y, c2w, cupw, cow):
    up_rows = 2 * H1

    # ---- stage 0: zero only the halo rows (+ statically-known F.pad rows) --
    xp1[0:1, :] = jnp.zeros((1, xp1.shape[1]), xp1.dtype)
    xp1[H2 + 1:H2 + 2, :] = jnp.zeros((1, xp1.shape[1]), xp1.dtype)
    xp2[0:1, :] = jnp.zeros((1, xp2.shape[1]), xp2.dtype)
    xp2[H2 + 1:H2 + 2, :] = jnp.zeros((1, xp2.shape[1]), xp2.dtype)
    if off_y > 0:                                   # F.pad rows above up(x1)
        xp1[1:1 + off_y, c2w:c2w + cupw] = jnp.zeros((off_y, cupw), xp1.dtype)
    if off_y + up_rows < H2:                        # F.pad rows below up(x1)
        rem = H2 - off_y - up_rows
        xp1[1 + off_y + up_rows:1 + H2, c2w:c2w + cupw] = jnp.zeros(
            (rem, cupw), xp1.dtype)

    # ---- stage 1: ConvTranspose2d(k=2, s=2): one matmul + tiny permutation --
    # y columns = [even-row block | odd-row block]; the permutation matmul
    # interleaves them into natural row order (replaces the old per-row store
    # loop). Unplaced horizontal F.pad columns stay 0 via the masked bias.
    y = jnp.dot(x1_ref[0], m_ref[...], preferred_element_type=jnp.float32)
    y = (y + aff_ref[0:1, 0:2 * cupw]).astype(xp1.dtype)
    s = jnp.concatenate([y[:, 0:cupw], y[:, cupw:2 * cupw]], axis=0)  # (2H1, cupw)
    up = jnp.dot(p_ref[...], s, preferred_element_type=jnp.float32).astype(xp1.dtype)

    # ---- stage 2: conv1 input = cat([x2, pad(up(x1))], C): two block stores -
    xp1[1:1 + H2, 0:c2w] = x2_ref[0]
    xp1[1 + off_y:1 + off_y + up_rows, c2w:c2w + cupw] = up

    # ---- stage 3: conv3x3 #1 (BN1 scale folded) -> shift -> ReLU ------------
    acc1 = jnp.dot(xp1[0:H2, :], wb1_ref[0], preferred_element_type=jnp.float32)
    acc1 = acc1 + jnp.dot(xp1[1:1 + H2, :], wb1_ref[1],
                          preferred_element_type=jnp.float32)
    acc1 = acc1 + jnp.dot(xp1[2:2 + H2, :], wb1_ref[2],
                          preferred_element_type=jnp.float32)
    xp2[1:1 + H2, :] = jnp.maximum(acc1 + aff_ref[1:2, 0:cow], 0.0).astype(xp2.dtype)

    # ---- stage 4: conv3x3 #2 (BN2 scale folded) -> shift -> ReLU ------------
    acc2 = jnp.dot(xp2[0:H2, :], wb2_ref[0], preferred_element_type=jnp.float32)
    acc2 = acc2 + jnp.dot(xp2[1:1 + H2, :], wb2_ref[1],
                          preferred_element_type=jnp.float32)
    acc2 = acc2 + jnp.dot(xp2[2:2 + H2, :], wb2_ref[2],
                          preferred_element_type=jnp.float32)
    o_ref[0] = jnp.maximum(acc2 + aff_ref[2:3, 0:cow], 0.0).astype(o_ref.dtype)


# -----------------------------------------------------------------------------
# Host-side (tiny, weight-only, one-time) precomputation helpers
# -----------------------------------------------------------------------------
def _band_conv_weights(w_oihw, W):
    """(Cout, Cin, 3, 3) -> (3, Cin*W, Cout*W) banded matrices implementing the
    3 horizontal taps + SAME horizontal padding of a 3x3 conv in the
    (c, w)-interleaved lane layout (one matrix per vertical tap ky)."""
    Cout, Cin = w_oihw.shape[0], w_oihw.shape[1]
    q = np.zeros((3, W, W), np.float32)                       # q[kx, wi, wo]
    for kx in range(3):
        for wo in range(W):
            wi = wo + kx - 1
            if 0 <= wi < W:
                q[kx, wi, wo] = 1.0
    q = jnp.asarray(q)
    mats = []
    for ky in range(3):
        w_ky = w_oihw[:, :, ky, :]                            # (o, c, kx)
        m = jnp.einsum("ock,kvw->cvow", w_ky, q)              # (c, wi, o, wo)
        mats.append(m.reshape(Cin * W, Cout * W))
    return jnp.stack(mats, axis=0)


def _up_matrices(wt, W1, W2, off_x):
    """(Cin, Cup, 2, 2) -> (2, Cin*W1, Cup*W2): ConvTranspose2d(k=2, s=2) as one
    matmul per output-row parity; horizontal F.pad offset baked in."""
    Cin, Cup = wt.shape[0], wt.shape[1]
    p = np.zeros((2, W1, W2), np.float32)                     # p[b, j, x]
    for b in range(2):
        for j in range(W1):
            p[b, j, off_x + 2 * j + b] = 1.0
    p = jnp.asarray(p)
    mats = []
    for a in range(2):
        m = jnp.einsum("iob,bjx->ijox", wt[:, :, a, :], p)    # (ci, j, co, x)
        mats.append(m.reshape(Cin * W1, Cup * W2))
    return jnp.stack(mats, axis=0)


def _bn_fold(gamma, beta, mean, var, eps=1e-5):
    inv = 1.0 / jnp.sqrt(var + eps)
    scale = gamma * inv
    shift = beta - mean * scale
    return scale, shift


def prepare_up_params(params, x1_shape, x2_shape):
    """One-time weight precompute (run OUTSIDE the per-call jit):
    ConvTranspose-as-matmul, banded conv weights, BN folding, and packing of
    two images per grid step (block-diagonal weights, 128-lane operands)."""
    _, Cin, H1, W1 = x1_shape
    _, C2, H2, W2 = x2_shape
    Cup = params["up_w"].shape[1]
    Cout = params["conv1_w"].shape[0]
    C1in = C2 + Cup
    assert params["up_w"].shape[0] == Cin
    assert params["conv1_w"].shape[1] == C1in
    diff_y, diff_x = H2 - 2 * H1, W2 - 2 * W1
    assert diff_y >= 0 and diff_x >= 0, "x2 must be at least as large as up(x1)"
    off_x = diff_x // 2

    c2w, cupw, cow = C2 * W2, Cup * W2, Cout * W2             # per-image widths

    # ConvTranspose2d as matmul per output-row parity + bias masked to the
    # horizontally-placed columns (so F.pad columns stay exactly 0).
    m_img = _up_matrices(params["up_w"], W1, W2, off_x)       # (2, Cin*W1, cupw)
    col_mask = np.zeros((W2,), np.float32)
    col_mask[off_x:off_x + 2 * W1] = 1.0
    bias_row = (params["up_b"][:, None] * jnp.asarray(col_mask)[None, :]
                ).reshape(cupw)

    # Fold BatchNorm(eval) scale into the banded conv weights; keep the shift.
    s1, t1 = _bn_fold(params["bn1_gamma"], params["bn1_beta"],
                      params["bn1_mean"], params["bn1_var"])
    s2, t2 = _bn_fold(params["bn2_gamma"], params["bn2_beta"],
                      params["bn2_mean"], params["bn2_var"])
    wb1 = _band_conv_weights(params["conv1_w"], W2) * jnp.repeat(s1, W2)[None, None, :]
    wb2 = _band_conv_weights(params["conv2_w"], W2) * jnp.repeat(s2, W2)[None, None, :]

    # ---- pack 2 images per grid step (image-major lane blocks) --------------
    def blk2(a):                                              # block_diag(a, a)
        z = jnp.zeros_like(a)
        return jnp.concatenate([jnp.concatenate([a, z], axis=1),
                                jnp.concatenate([z, a], axis=1)], axis=0)

    M0, M1 = m_img[0], m_img[1]
    Zm = jnp.zeros_like(M0)
    # rows = [A_x1 | B_x1]; cols = [A_even | B_even | A_odd | B_odd]
    m_packed = jnp.concatenate(
        [jnp.concatenate([M0, Zm, M1, Zm], axis=1),
         jnp.concatenate([Zm, M0, Zm, M1], axis=1)], axis=0)  # (2*Cin*W1, 4*cupw)

    # conv1: K rows ordered like the xp1 lanes [A_x2 | B_x2 | A_up | B_up],
    # output cols = [A_out | B_out]
    wb1_x2, wb1_up = wb1[:, :c2w, :], wb1[:, c2w:, :]
    wb1_packed = jnp.stack(
        [jnp.concatenate([blk2(wb1_x2[k]), blk2(wb1_up[k])], axis=0)
         for k in range(3)])                                  # (3, 2*C1in*W2, 2*cow)
    wb2_packed = jnp.stack([blk2(wb2[k]) for k in range(3)])  # (3, 2*cow, 2*cow)

    # permutation interleaving [even rows ; odd rows] -> natural row order
    perm = np.zeros((2 * H1, 2 * H1), np.float32)
    perm[2 * np.arange(H1), np.arange(H1)] = 1.0
    perm[2 * np.arange(H1) + 1, H1 + np.arange(H1)] = 1.0

    bias_pack = jnp.tile(bias_row, 4)                         # [Ae, Be, Ao, Bo]
    shift1 = jnp.tile(jnp.repeat(t1, W2), 2)                  # [A, B]
    shift2 = jnp.tile(jnp.repeat(t2, W2), 2)
    lmax = max(4 * cupw, 2 * cow)
    pad1 = lambda v: jnp.pad(v, (0, lmax - v.shape[0]))
    aff = jnp.stack([pad1(bias_pack), pad1(shift1), pad1(shift2)]).astype(jnp.float32)

    return {
        "m": m_packed.astype(jnp.bfloat16),
        "perm": jnp.asarray(perm).astype(jnp.bfloat16),
        "wb1": wb1_packed.astype(jnp.bfloat16),
        "wb2": wb2_packed.astype(jnp.bfloat16),
        "aff": aff,
    }


# -----------------------------------------------------------------------------
# Up.forward (public wrapper: NCHW in / NCHW out); jit this.
# -----------------------------------------------------------------------------
def up_forward(prepped, x1_nchw, x2_nchw):
    N, Cin, H1, W1 = x1_nchw.shape
    _, C2, H2, W2 = x2_nchw.shape
    cow = prepped["wb2"].shape[-1]                    # 2*Cout*W2 (per-pair)
    cupw = prepped["m"].shape[-1] // 2                # 2*Cup*W2  (per-pair)
    c2w = 2 * C2 * W2                                 # per-pair
    Cout = cow // (2 * W2)
    assert c2w + cupw == prepped["wb1"].shape[1]
    off_y = (H2 - 2 * H1) // 2

    # pad batch to even and pack image pairs side by side in lanes
    Np = N + (N % 2)
    if Np != N:
        bpad = ((0, Np - N), (0, 0), (0, 0), (0, 0))
        x1_nchw = jnp.pad(x1_nchw, bpad)
        x2_nchw = jnp.pad(x2_nchw, bpad)
    P = Np // 2

    def pack(x, C, H, W):
        x = x.astype(jnp.float32).transpose(0, 2, 1, 3).reshape(Np, H, C * W)
        x = x.reshape(P, 2, H, C * W).transpose(0, 2, 1, 3)
        return x.reshape(P, H, 2 * C * W).astype(jnp.bfloat16)

    x1p = pack(x1_nchw, Cin, H1, W1)                  # (P, H1, 2*Cin*W1)
    x2p = pack(x2_nchw, C2, H2, W2)                   # (P, H2, c2w)

    kernel = functools.partial(_up_fused_kernel, H1=H1, H2=H2, off_y=off_y,
                               c2w=c2w, cupw=cupw, cow=cow)

    out_p = pl.pallas_call(
        kernel,
        out_shape=jax.ShapeDtypeStruct((P, H2, cow), jnp.float32),
        grid=(P,),
        in_specs=[
            pl.BlockSpec((1,) + x1p.shape[1:], lambda p: (p, 0, 0)),
            pl.BlockSpec((1,) + x2p.shape[1:], lambda p: (p, 0, 0)),
            pl.BlockSpec(prepped["m"].shape, lambda p: (0, 0)),
            pl.BlockSpec(prepped["perm"].shape, lambda p: (0, 0)),
            pl.BlockSpec(prepped["wb1"].shape, lambda p: (0, 0, 0)),
            pl.BlockSpec(prepped["wb2"].shape, lambda p: (0, 0, 0)),
            pl.BlockSpec(prepped["aff"].shape, lambda p: (0, 0)),
        ],
        out_specs=pl.BlockSpec((1, H2, cow), lambda p: (p, 0, 0)),
        scratch_shapes=[
            pltpu.VMEM((H2 + 2, c2w + cupw), jnp.bfloat16),   # cat([x2, up]) + halo
            pltpu.VMEM((H2 + 2, cow), jnp.bfloat16),          # conv1 output + halo
        ],
        # grid over image pairs: still "parallel" so batches N >= 4 feed both
        # v7x TensorCores; at N=2 it is a single (overhead-minimal) step.
        compiler_params=pltpu.CompilerParams(dimension_semantics=("parallel",)),
    )(x1p, x2p, prepped["m"], prepped["perm"], prepped["wb1"],
      prepped["wb2"], prepped["aff"])

    # unpack pairs -> NCHW (tiny wrapper-side layout glue)
    out = out_p.reshape(P, H2, 2, Cout, W2).transpose(0, 2, 3, 1, 4)
    return out.reshape(Np, Cout, H2, W2)[:N]


# -----------------------------------------------------------------------------
# Pure-JAX reference (for correctness check)
# -----------------------------------------------------------------------------
def _ref_conv_bn_relu(x, w_oihw, gamma, beta, mean, var, eps=1e-5):
    w = jnp.transpose(w_oihw, (2, 3, 1, 0))                   # HWIO
    y = jax.lax.conv_general_dilated(
        x, w, (1, 1), "SAME", dimension_numbers=("NHWC", "HWIO", "NHWC"))
    y = (y - mean) / jnp.sqrt(var + eps) * gamma + beta
    return jnp.maximum(y, 0.0)


def ref_up_forward(params, x1_nchw, x2_nchw):
    x1 = jnp.transpose(x1_nchw, (0, 2, 3, 1)).astype(jnp.float32)
    x2 = jnp.transpose(x2_nchw, (0, 2, 3, 1)).astype(jnp.float32)
    wt = params["up_w"]
    N, H, W, _ = x1.shape
    Cup = wt.shape[1]
    y = jnp.einsum("nhwi,ioab->nhawbo", x1, wt).reshape(N, 2 * H, 2 * W, Cup)
    y = y + params["up_b"]
    diffY = x2.shape[1] - y.shape[1]
    diffX = x2.shape[2] - y.shape[2]
    y = jnp.pad(y, ((0, 0),
                    (diffY // 2, diffY - diffY // 2),
                    (diffX // 2, diffX - diffX // 2),
                    (0, 0)))
    x = jnp.concatenate([x2, y], axis=-1)
    h = _ref_conv_bn_relu(x, params["conv1_w"], params["bn1_gamma"],
                          params["bn1_beta"], params["bn1_mean"], params["bn1_var"])
    h = _ref_conv_bn_relu(h, params["conv2_w"], params["bn2_gamma"],
                          params["bn2_beta"], params["bn2_mean"], params["bn2_var"])
    return jnp.transpose(h, (0, 3, 1, 2))


# -----------------------------------------------------------------------------
def make_params(key, in_ch, out_ch):
    ks = jax.random.split(key, 12)
    f32 = jnp.float32
    return {
        # ConvTranspose2d(in_ch, in_ch//2, 2, 2): weight (Cin, Cout, kH, kW)
        "up_w": 0.2 * jax.random.normal(ks[0], (in_ch, in_ch // 2, 2, 2), f32),
        "up_b": 0.1 * jax.random.normal(ks[1], (in_ch // 2,), f32),
        # DoubleConv: Conv2d(in_ch, out_ch, 3, bias=False), BN(out_ch)
        "conv1_w": 0.2 * jax.random.normal(ks[2], (out_ch, in_ch, 3, 3), f32),
        "bn1_gamma": 1.0 + 0.1 * jax.random.normal(ks[3], (out_ch,), f32),
        "bn1_beta": 0.1 * jax.random.normal(ks[4], (out_ch,), f32),
        "bn1_mean": 0.1 * jax.random.normal(ks[5], (out_ch,), f32),
        "bn1_var": 0.5 + jnp.abs(jax.random.normal(ks[6], (out_ch,), f32)),
        # Conv2d(out_ch, out_ch, 3, bias=False), BN(out_ch)
        "conv2_w": 0.2 * jax.random.normal(ks[7], (out_ch, out_ch, 3, 3), f32),
        "bn2_gamma": 1.0 + 0.1 * jax.random.normal(ks[8], (out_ch,), f32),
        "bn2_beta": 0.1 * jax.random.normal(ks[9], (out_ch,), f32),
        "bn2_mean": 0.1 * jax.random.normal(ks[10], (out_ch,), f32),
        "bn2_var": 0.5 + jnp.abs(jax.random.normal(ks[11], (out_ch,), f32)),
    }


if __name__ == "__main__":
    in_ch, out_ch = 8, 4           # Up(in_channels=8, out_channels=4, depthwise=False)
    N, H1, W1 = 2, 8, 8            # x1: encoder feature to upsample
    H2, W2 = 16, 16                # x2: skip connection

    key = jax.random.PRNGKey(0)
    kp, kx1, kx2 = jax.random.split(key, 3)
    params = make_params(kp, in_ch, out_ch)

    x1 = jax.random.normal(kx1, (N, in_ch, H1, W1), jnp.float32)       # NCHW
    x2 = jax.random.normal(kx2, (N, in_ch // 2, H2, W2), jnp.float32)  # NCHW

    # One-time weight precompute, hoisted out of the per-call jitted path.
    prepped = prepare_up_params(params, x1.shape, x2.shape)

    fwd = jax.jit(up_forward)
    out = jax.block_until_ready(fwd(prepped, x1, x2))

    ref = jax.block_until_ready(ref_up_forward(params, x1, x2))
    assert out.shape == (N, out_ch, H2, W2), out.shape
    # bf16 weights/activations with f32 accumulation -> loosened tolerance
    # (previous all-f32 version used 2e-4; see perf-review correctness note).
    np.testing.assert_allclose(np.asarray(out), np.asarray(ref),
                               rtol=3e-2, atol=3e-2)

    print("KERNEL_OK")
</pallas_src>

<mosaic_0001>
module attributes {stable_mosaic.version = 11 : i64} {
  func.func @_up_fused_kernel(%arg0: i32, %arg1: memref<1x8x128xbf16, #tpu.memory_space<vmem>>, %arg2: memref<1x16x128xbf16, #tpu.memory_space<vmem>>, %arg3: memref<128x256xbf16, #tpu.memory_space<vmem>>, %arg4: memref<16x16xbf16, #tpu.memory_space<vmem>>, %arg5: memref<3x256x128xbf16, #tpu.memory_space<vmem>>, %arg6: memref<3x128x128xbf16, #tpu.memory_space<vmem>>, %arg7: memref<3x256xf32, #tpu.memory_space<vmem>>, %arg8: memref<1x16x128xf32, #tpu.memory_space<vmem>>, %arg9: memref<18x256xbf16, #tpu.memory_space<vmem>>, %arg10: memref<18x128xbf16, #tpu.memory_space<vmem>>) attributes {dimension_semantics = [#tpu.dimension_semantics<parallel>], iteration_bounds = array<i64: 1>, scalar_prefetch = 0 : i64, scratch_operands = 2 : i64, tpu.core_type = #tpu.core_type<tc>, window_params = [{transform_indices = @transform_0, window_bounds = array<i64: 1, 8, 128>}, {transform_indices = @transform_1, window_bounds = array<i64: 1, 16, 128>}, {pipeline_mode = #tpu.pipeline_mode<synchronous>, transform_indices = @transform_2, window_bounds = array<i64: 128, 256>}, {pipeline_mode = #tpu.pipeline_mode<synchronous>, transform_indices = @transform_3, window_bounds = array<i64: 16, 16>}, {pipeline_mode = #tpu.pipeline_mode<synchronous>, transform_indices = @transform_4, window_bounds = array<i64: 3, 256, 128>}, {pipeline_mode = #tpu.pipeline_mode<synchronous>, transform_indices = @transform_5, window_bounds = array<i64: 3, 128, 128>}, {pipeline_mode = #tpu.pipeline_mode<synchronous>, transform_indices = @transform_6, window_bounds = array<i64: 3, 256>}, {transform_indices = @transform_7, window_bounds = array<i64: 1, 16, 128>}]} {
    %cst = arith.constant 0.000000e+00 : bf16
    %0 = vector.broadcast %cst : bf16 to vector<1x256xbf16>
    %c0 = arith.constant 0 : index
    %c0_0 = arith.constant 0 : index
    %1 = vector.load %arg9[%c0, %c0_0] : memref<18x256xbf16, #tpu.memory_space<vmem>>, vector<1x256xbf16>
    tpu.vector_store %arg9[%c0, %c0_0], %0 {strides = array<i32>} : memref<18x256xbf16, #tpu.memory_space<vmem>>, vector<1x256xbf16>,
    %cst_1 = arith.constant 0.000000e+00 : bf16
    %2 = vector.broadcast %cst_1 : bf16 to vector<1x256xbf16>
    %c17 = arith.constant 17 : index
    %c0_2 = arith.constant 0 : index
    %3 = vector.load %arg9[%c17, %c0_2] : memref<18x256xbf16, #tpu.memory_space<vmem>>, vector<1x256xbf16>
    tpu.vector_store %arg9[%c17, %c0_2], %2 {strides = array<i32>} : memref<18x256xbf16, #tpu.memory_space<vmem>>, vector<1x256xbf16>,
    %cst_3 = arith.constant 0.000000e+00 : bf16
    %4 = vector.broadcast %cst_3 : bf16 to vector<1x128xbf16>
    %c0_4 = arith.constant 0 : index
    %c0_5 = arith.constant 0 : index
    %5 = vector.load %arg10[%c0_4, %c0_5] : memref<18x128xbf16, #tpu.memory_space<vmem>>, vector<1x128xbf16>
    tpu.vector_store %arg10[%c0_4, %c0_5], %4 {strides = array<i32>} : memref<18x128xbf16, #tpu.memory_space<vmem>>, vector<1x128xbf16>,
    %cst_6 = arith.constant 0.000000e+00 : bf16
    %6 = vector.broadcast %cst_6 : bf16 to vector<1x128xbf16>
    %c17_7 = arith.constant 17 : index
    %c0_8 = arith.constant 0 : index
    %7 = vector.load %arg10[%c17_7, %c0_8] : memref<18x128xbf16, #tpu.memory_space<vmem>>, vector<1x128xbf16>
    tpu.vector_store %arg10[%c17_7, %c0_8], %6 {strides = array<i32>} : memref<18x128xbf16, #tpu.memory_space<vmem>>, vector<1x128xbf16>,
    %c0_9 = arith.constant 0 : index
    %c0_10 = arith.constant 0 : index
    %c0_11 = arith.constant 0 : index
    %8 = vector.load %arg1[%c0_9, %c0_10, %c0_11] : memref<1x8x128xbf16, #tpu.memory_space<vmem>>, vector<1x8x128xbf16>
    %9 = vector.shape_cast %8 : vector<1x8x128xbf16> to vector<8x128xbf16>
    %c0_12 = arith.constant 0 : index
    %c0_13 = arith.constant 0 : index
    %10 = vector.load %arg3[%c0_12, %c0_13] : memref<128x256xbf16, #tpu.memory_space<vmem>>, vector<128x256xbf16>
    %cst_14 = arith.constant dense<0.000000e+00> : vector<8x256xf32>
    %11 = tpu.matmul %9, %10, %cst_14 {dimension_numbers = #tpu.dot_dimension_numbers<[1], [0], [0], [1], [0, 0, 1, 1], [], []>} : vector<8x128xbf16>, vector<128x256xbf16>, vector<8x256xf32> -> vector<8x256xf32>
    %c0_15 = arith.constant 0 : index
    %c0_16 = arith.constant 0 : index
    %12 = vector.load %arg7[%c0_15, %c0_16] : memref<3x256xf32, #tpu.memory_space<vmem>>, vector<1x256xf32>
    %13 = vector.broadcast %12 : vector<1x256xf32> to vector<8x256xf32>
    %14 = arith.addf %11, %13 : vector<8x256xf32>
    %15 = arith.truncf %14 : vector<8x256xf32> to vector<8x256xbf16>
    %16 = vector.extract_strided_slice %15 {offsets = [0, 0], sizes = [8, 128], strides = [1, 1]} : vector<8x256xbf16> to vector<8x128xbf16>
    %17 = vector.extract_strided_slice %15 {offsets = [0, 128], sizes = [8, 128], strides = [1, 1]} : vector<8x256xbf16> to vector<8x128xbf16>
    %18 = tpu.concatenate %16, %17 in 0 : vector<8x128xbf16>, vector<8x128xbf16> -> vector<16x128xbf16>
    %c0_17 = arith.constant 0 : index
    %c0_18 = arith.constant 0 : index
    %19 = vector.load %arg4[%c0_17, %c0_18] : memref<16x16xbf16, #tpu.memory_space<vmem>>, vector<16x16xbf16>
    %cst_19 = arith.constant dense<0.000000e+00> : vector<16x128xf32>
    %20 = tpu.matmul %19, %18, %cst_19 {dimension_numbers = #tpu.dot_dimension_numbers<[1], [0], [0], [1], [0, 0, 1, 1], [], []>} : vector<16x16xbf16>, vector<16x128xbf16>, vector<16x128xf32> -> vector<16x128xf32>
    %21 = arith.truncf %20 : vector<16x128xf32> to vector<16x128xbf16>
    %c0_20 = arith.constant 0 : index
    %c0_21 = arith.constant 0 : index
    %c0_22 = arith.constant 0 : index
    %22 = vector.load %arg2[%c0_20, %c0_21, %c0_22] : memref<1x16x128xbf16, #tpu.memory_space<vmem>>, vector<1x16x128xbf16>
    %23 = vector.shape_cast %22 : vector<1x16x128xbf16> to vector<16x128xbf16>
    %c1 = arith.constant 1 : index
    %c0_23 = arith.constant 0 : index
    %24 = vector.load %arg9[%c1, %c0_23] : memref<18x256xbf16, #tpu.memory_space<vmem>>, vector<16x128xbf16>
    tpu.vector_store %arg9[%c1, %c0_23], %23 {strides = array<i32>} : memref<18x256xbf16, #tpu.memory_space<vmem>>, vector<16x128xbf16>,
    %c1_24 = arith.constant 1 : index
    %c128 = arith.constant 128 : index
    %25 = vector.load %arg9[%c1_24, %c128] : memref<18x256xbf16, #tpu.memory_space<vmem>>, vector<16x128xbf16>
    tpu.vector_store %arg9[%c1_24, %c128], %21 {strides = array<i32>} : memref<18x256xbf16, #tpu.memory_space<vmem>>, vector<16x128xbf16>,
    %c0_25 = arith.constant 0 : index
    %c0_26 = arith.constant 0 : index
    %26 = vector.load %arg9[%c0_25, %c0_26] : memref<18x256xbf16, #tpu.memory_space<vmem>>, vector<16x256xbf16>
    %c0_27 = arith.constant 0 : index
    %c0_28 = arith.constant 0 : index
    %c0_29 = arith.constant 0 : index
    %27 = vector.load %arg5[%c0_27, %c0_28, %c0_29] : memref<3x256x128xbf16, #tpu.memory_space<vmem>>, vector<1x256x128xbf16>
    %28 = vector.shape_cast %27 : vector<1x256x128xbf16> to vector<256x128xbf16>
    %cst_30 = arith.constant dense<0.000000e+00> : vector<16x128xf32>
    %29 = tpu.matmul %26, %28, %cst_30 {dimension_numbers = #tpu.dot_dimension_numbers<[1], [0], [0], [1], [0, 0, 1, 1], [], []>} : vector<16x256xbf16>, vector<256x128xbf16>, vector<16x128xf32> -> vector<16x128xf32>
    %c1_31 = arith.constant 1 : index
    %c0_32 = arith.constant 0 : index
    %30 = vector.load %arg9[%c1_31, %c0_32] : memref<18x256xbf16, #tpu.memory_space<vmem>>, vector<16x256xbf16>
    %c1_33 = arith.constant 1 : index
    %c0_34 = arith.constant 0 : index
    %c0_35 = arith.constant 0 : index
    %31 = vector.load %arg5[%c1_33, %c0_34, %c0_35] : memref<3x256x128xbf16, #tpu.memory_space<vmem>>, vector<1x256x128xbf16>
    %32 = vector.shape_cast %31 : vector<1x256x128xbf16> to vector<256x128xbf16>
    %cst_36 = arith.constant dense<0.000000e+00> : vector<16x128xf32>
    %33 = tpu.matmul %30, %32, %cst_36 {dimension_numbers = #tpu.dot_dimension_numbers<[1], [0], [0], [1], [0, 0, 1, 1], [], []>} : vector<16x256xbf16>, vector<256x128xbf16>, vector<16x128xf32> -> vector<16x128xf32>
    %34 = arith.addf %29, %33 : vector<16x128xf32>
    %c2 = arith.constant 2 : index
    %c0_37 = arith.constant 0 : index
    %35 = vector.load %arg9[%c2, %c0_37] : memref<18x256xbf16, #tpu.memory_space<vmem>>, vector<16x256xbf16>
    %c2_38 = arith.constant 2 : index
    %c0_39 = arith.constant 0 : index
    %c0_40 = arith.constant 0 : index
    %36 = vector.load %arg5[%c2_38, %c0_39, %c0_40] : memref<3x256x128xbf16, #tpu.memory_space<vmem>>, vector<1x256x128xbf16>
    %37 = vector.shape_cast %36 : vector<1x256x128xbf16> to vector<256x128xbf16>
    %cst_41 = arith.constant dense<0.000000e+00> : vector<16x128xf32>
    %38 = tpu.matmul %35, %37, %cst_41 {dimension_numbers = #tpu.dot_dimension_numbers<[1], [0], [0], [1], [0, 0, 1, 1], [], []>} : vector<16x256xbf16>, vector<256x128xbf16>, vector<16x128xf32> -> vector<16x128xf32>
    %39 = arith.addf %34, %38 : vector<16x128xf32>
    %c1_42 = arith.constant 1 : index
    %c0_43 = arith.constant 0 : index
    %40 = vector.load %arg7[%c1_42, %c0_43] : memref<3x256xf32, #tpu.memory_space<vmem>>, vector<1x128xf32>
    %41 = vector.broadcast %40 : vector<1x128xf32> to vector<16x128xf32>
    %42 = arith.addf %39, %41 : vector<16x128xf32>
    %cst_44 = arith.constant 0.000000e+00 : f32
    %43 = vector.broadcast %cst_44 : f32 to vector<16x128xf32>
    %44 = arith.maximumf %42, %43 : vector<16x128xf32>
    %45 = arith.truncf %44 : vector<16x128xf32> to vector<16x128xbf16>
    %c1_45 = arith.constant 1 : index
    %c0_46 = arith.constant 0 : index
    %46 = vector.load %arg10[%c1_45, %c0_46] : memref<18x128xbf16, #tpu.memory_space<vmem>>, vector<16x128xbf16>
    tpu.vector_store %arg10[%c1_45, %c0_46], %45 {strides = array<i32>} : memref<18x128xbf16, #tpu.memory_space<vmem>>, vector<16x128xbf16>,
    %c0_47 = arith.constant 0 : index
    %c0_48 = arith.constant 0 : index
    %47 = vector.load %arg10[%c0_47, %c0_48] : memref<18x128xbf16, #tpu.memory_space<vmem>>, vector<16x128xbf16>
    %c0_49 = arith.constant 0 : index
    %c0_50 = arith.constant 0 : index
    %c0_51 = arith.constant 0 : index
    %48 = vector.load %arg6[%c0_49, %c0_50, %c0_51] : memref<3x128x128xbf16, #tpu.memory_space<vmem>>, vector<1x128x128xbf16>
    %49 = vector.shape_cast %48 : vector<1x128x128xbf16> to vector<128x128xbf16>
    %cst_52 = arith.constant dense<0.000000e+00> : vector<16x128xf32>
    %50 = tpu.matmul %47, %49, %cst_52 {dimension_numbers = #tpu.dot_dimension_numbers<[1], [0], [0], [1], [0, 0, 1, 1], [], []>} : vector<16x128xbf16>, vector<128x128xbf16>, vector<16x128xf32> -> vector<16x128xf32>
    %c1_53 = arith.constant 1 : index
    %c0_54 = arith.constant 0 : index
    %51 = vector.load %arg10[%c1_53, %c0_54] : memref<18x128xbf16, #tpu.memory_space<vmem>>, vector<16x128xbf16>
    %c1_55 = arith.constant 1 : index
    %c0_56 = arith.constant 0 : index
    %c0_57 = arith.constant 0 : index
    %52 = vector.load %arg6[%c1_55, %c0_56, %c0_57] : memref<3x128x128xbf16, #tpu.memory_space<vmem>>, vector<1x128x128xbf16>
    %53 = vector.shape_cast %52 : vector<1x128x128xbf16> to vector<128x128xbf16>
    %cst_58 = arith.constant dense<0.000000e+00> : vector<16x128xf32>
    %54 = tpu.matmul %51, %53, %cst_58 {dimension_numbers = #tpu.dot_dimension_numbers<[1], [0], [0], [1], [0, 0, 1, 1], [], []>} : vector<16x128xbf16>, vector<128x128xbf16>, vector<16x128xf32> -> vector<16x128xf32>
    %55 = arith.addf %50, %54 : vector<16x128xf32>
    %c2_59 = arith.constant 2 : index
    %c0_60 = arith.constant 0 : index
    %56 = vector.load %arg10[%c2_59, %c0_60] : memref<18x128xbf16, #tpu.memory_space<vmem>>, vector<16x128xbf16>
    %c2_61 = arith.constant 2 : index
    %c0_62 = arith.constant 0 : index
    %c0_63 = arith.constant 0 : index
    %57 = vector.load %arg6[%c2_61, %c0_62, %c0_63] : memref<3x128x128xbf16, #tpu.memory_space<vmem>>, vector<1x128x128xbf16>
    %58 = vector.shape_cast %57 : vector<1x128x128xbf16> to vector<128x128xbf16>
    %cst_64 = arith.constant dense<0.000000e+00> : vector<16x128xf32>
    %59 = tpu.matmul %56, %58, %cst_64 {dimension_numbers = #tpu.dot_dimension_numbers<[1], [0], [0], [1], [0, 0, 1, 1], [], []>} : vector<16x128xbf16>, vector<128x128xbf16>, vector<16x128xf32> -> vector<16x128xf32>
    %60 = arith.addf %55, %59 : vector<16x128xf32>
    %c2_65 = arith.constant 2 : index
    %c0_66 = arith.constant 0 : index
    %61 = vector.load %arg7[%c2_65, %c0_66] : memref<3x256xf32, #tpu.memory_space<vmem>>, vector<1x128xf32>
    %62 = vector.broadcast %61 : vector<1x128xf32> to vector<16x128xf32>
    %63 = arith.addf %60, %62 : vector<16x128xf32>
    %cst_67 = arith.constant 0.000000e+00 : f32
    %64 = vector.broadcast %cst_67 : f32 to vector<16x128xf32>
    %65 = arith.maximumf %63, %64 : vector<16x128xf32>
    %c0_68 = arith.constant 0 : index
    %c0_69 = arith.constant 0 : index
    %c0_70 = arith.constant 0 : index
    %66 = vector.load %arg8[%c0_68, %c0_69, %c0_70] : memref<1x16x128xf32, #tpu.memory_space<vmem>>, vector<1x16x128xf32>
    %67 = vector.shape_cast %66 : vector<1x16x128xf32> to vector<16x128xf32>
    %68 = vector.shape_cast %65 : vector<16x128xf32> to vector<1x16x128xf32>
    tpu.vector_store %arg8[%c0_68, %c0_69, %c0_70], %68 {strides = array<i32>} : memref<1x16x128xf32, #tpu.memory_space<vmem>>, vector<1x16x128xf32>,
    return
  }
  func.func @transform_0(%arg0: i32) -> (i32, i32, i32) {
    %c0_i32 = arith.constant 0 : i32
    %c0_i32_0 = arith.constant 0 : i32
    %c0_i32_1 = arith.constant 0 : i32
    return %arg0, %c0_i32, %c0_i32_0 : i32, i32, i32
  }
  func.func @transform_1(%arg0: i32) -> (i32, i32, i32) {
    %c0_i32 = arith.constant 0 : i32
    %c0_i32_0 = arith.constant 0 : i32
    %c0_i32_1 = arith.constant 0 : i32
    return %arg0, %c0_i32, %c0_i32_0 : i32, i32, i32
  }
  func.func @transform_2(%arg0: i32) -> (i32, i32) {
    %c0_i32 = arith.constant 0 : i32
    %c0_i32_0 = arith.constant 0 : i32
    %c0_i32_1 = arith.constant 0 : i32
    return %c0_i32, %c0_i32_0 : i32, i32
  }
  func.func @transform_3(%arg0: i32) -> (i32, i32) {
    %c0_i32 = arith.constant 0 : i32
    %c0_i32_0 = arith.constant 0 : i32
    %c0_i32_1 = arith.constant 0 : i32
    return %c0_i32, %c0_i32_0 : i32, i32
  }
  func.func @transform_4(%arg0: i32) -> (i32, i32, i32) {
    %c0_i32 = arith.constant 0 : i32
    %c0_i32_0 = arith.constant 0 : i32
    %c0_i32_1 = arith.constant 0 : i32
    %c0_i32_2 = arith.constant 0 : i32
    return %c0_i32, %c0_i32_0, %c0_i32_1 : i32, i32, i32
  }
  func.func @transform_5(%arg0: i32) -> (i32, i32, i32) {
    %c0_i32 = arith.constant 0 : i32
    %c0_i32_0 = arith.constant 0 : i32
    %c0_i32_1 = arith.constant 0 : i32
    %c0_i32_2 = arith.constant 0 : i32
    return %c0_i32, %c0_i32_0, %c0_i32_1 : i32, i32, i32
  }
  func.func @transform_6(%arg0: i32) -> (i32, i32) {
    %c0_i32 = arith.constant 0 : i32
    %c0_i32_0 = arith.constant 0 : i32
    %c0_i32_1 = arith.constant 0 : i32
    return %c0_i32, %c0_i32_0 : i32, i32
  }
  func.func @transform_7(%arg0: i32) -> (i32, i32, i32) {
    %c0_i32 = arith.constant 0 : i32
    %c0_i32_0 = arith.constant 0 : i32
    %c0_i32_1 = arith.constant 0 : i32
    return %arg0, %c0_i32, %c0_i32_0 : i32, i32, i32
  }
}

</mosaic_0001>

<bundles_post_ra>
// kernel: up_forward.1
= control target key start
LH: loop header
LB: loop body
LE: loop exit
PB: predicated region body
PF: predicated region fallthrough
CT: control target
= control target key end

     0   :  { %v1783_v1 = vmov 0   ;;  %vm27_vm0 = vcmask 1040384   ;;  %vm28_vm1 = vsmask.f32 256  ;;  %vm30_vm2 = vcmask 1044484   ;;  %s2220_s2 = inlined_call_operand.vmem [shape: bf16[128,256], index: 2, kind: input, shape index: {}]   ;;  %s2221_s0 = inlined_call_operand.vmem [shape: bf16[1,8,128], index: 0, kind: input, shape index: {}]   ;;  %s2222_s1 = inlined_call_operand.vmem [shape: bf16[1,16,128], index: 1, kind: input, shape index: {}]   ;;  %s2223_s3 = inlined_call_operand.vmem [shape: bf16[16,16], index: 3, kind: input, shape index: {}]   ;;  %s2224_s4 = inlined_call_operand.vmem [shape: bf16[3,256,128], index: 4, kind: input, shape index: {}]   ;;  %s2225_s6 = inlined_call_operand.vmem [shape: f32[3,256], index: 6, kind: input, shape index: {}]   ;;  %s2226_s5 = inlined_call_operand.vmem [shape: bf16[3,128,128], index: 5, kind: input, shape index: {}]   ;;  %s2227_s7 = inlined_call_operand.vmem [shape: f32[1,16,128], index: 7, kind: output, shape index: {}]  }
   0x1   :  { %v1677_v0 = vld [vmem:[%s2220_s2 + $0x4] ss:$8 sps:$4 sm:$0xff]   ;;  %192 = vmatprep.mubr.bf16.mxu0 %v1783_v1  ;;  %v1679_v2 = vld [vmem:[%s2220_s2] ss:$8 sps:$4 sm:$0xff]   ;;  %v1680_v3 = vld [vmem:[%s2220_s2 + $0x14] ss:$8 sps:$4 sm:$0xff]   ;;  %v70_v53 = vlaneseq }
   0x2   :  { %160 = vmatprep.subr.bf16.mxu0 %v1677_v0  ;;  %v1682_v4 = vld [vmem:[%s2220_s2 + $0x10] ss:$8 sps:$4 sm:$0xff]   ;;  %v1683_v5 = vld [vmem:[%s2220_s2 + $0x24] ss:$8 sps:$4 sm:$0xff]   ;;  %v1685_v6 = vld [vmem:[%s2220_s2 + $0x20] ss:$8 sps:$4 sm:$0xff]  }
   0x3   :  { %161 = vmatpush1.bf16.msra.mxu0 %v1679_v2  ;;  %v1686_v7 = vld [vmem:[%s2220_s2 + $0x34] ss:$8 sps:$4 sm:$0xff]   ;;  %v1688_v8 = vld [vmem:[%s2220_s2 + $0x30] ss:$8 sps:$4 sm:$0xff]   ;;  %v1689_v9 = vld [vmem:[%s2220_s2 + $0x44] ss:$8 sps:$4 sm:$0xff]  }
   0x4   :  { %162 = vmatprep.subr.bf16.mxu0 %v1680_v3  ;;  %v1691_v10 = vld [vmem:[%s2220_s2 + $0x40] ss:$8 sps:$4 sm:$0xff]   ;;  %v1692_v11 = vld [vmem:[%s2220_s2 + $0x54] ss:$8 sps:$4 sm:$0xff]   ;;  %v1694_v12 = vld [vmem:[%s2220_s2 + $0x50] ss:$8 sps:$4 sm:$0xff]  }
   0x5   :  { %v1695_v13 = vld [vmem:[%s2220_s2 + $0x64] ss:$8 sps:$4 sm:$0xff]   ;;  %v1697_v14 = vld [vmem:[%s2220_s2 + $0x60] ss:$8 sps:$4 sm:$0xff]   ;;  %v1698_v15 = vld [vmem:[%s2220_s2 + $0x74] ss:$8 sps:$4 sm:$0xff]  }
   0x6   :  { %v1700_v16 = vld [vmem:[%s2220_s2 + $0x70] ss:$8 sps:$4 sm:$0xff]   ;;  %v51_v17 = vld [vmem:[%s2221_s0] sm:$0xf]  ;;  %v1784_v18 = vmov 0.0   ;;  %vm1880_vm3 = vmand %vm27_vm0, %vm28_vm1  ;;  %vm205_vm13 = vcmask 1043456  }
   0x7   :  { %163 = vmatpush1.bf16.msra.mxu0 %v1682_v4  ;;  %1608 = vmatprep.subr.bf16.mxu1 %v1784_v18  ;;  %vm31_vm4 = vsmask.f32 4352  ;;  %v34_v20 = vld [vmem:[#allocation2] sm:$0x11]  ;;  %vm37_vm5 = vsmask.f32 7938 }
   0x8   :  { %164 = vmatprep.subr.bf16.mxu0 %v1683_v5  ;;  %vm32_vm6 = vmand %vm30_vm2, %vm31_vm4  ;;  %vm39_vm7 = vsmask.f32 7954  ;;  %v42_v21 = vld [vmem:[#allocation2 + $0x10] sm:$0x11]  ;;  %v45_v22 = vld [vmem:[#allocation3] sm:$0x1] }
   0x9   :  { %vm33_vm8 = vmor %vm32_vm6, %vm1880_vm3  ;;  %v46_v23 = vsel %vm1880_vm3, 0, %v45_v22  ;;  %v48_v24 = vld [vmem:[#allocation3 + $0x8] sm:$0x1]  ;;  %v264_v28 = vld [vmem:[%s2222_s1 + $0x4] sm:$0xf]  ;;  %vm1785_vm15 = vmmov 0  }
   0xa   :  { %v263_v25 = vld [vmem:[%s2222_s1] sm:$0xf]  ;;  %v35_v26 = vsel %vm33_vm8, 0, %v34_v20  ;;  %vm1894_vm9 = vmand %vm27_vm0, %vm37_vm5  ;;  %47 = vst [vmem:[#allocation3] sm:$0x1] %v46_v23  ;;  %v276_v32 = vshrl.u32 %v264_v28, 16  ;;  %1610 = vmatprep.mubr.msk.bf16.mxu1 %vm1785_vm15, %v1784_v18 }
   0xb   :  { %165 = vmatpush1.bf16.msra.mxu0 %v1685_v6  ;;  %vm265_vm10 = vsmask.f32 4368  ;;  %v268_v29 = vshrl.u32 %v263_v25, 16  ;;  %36 = vst [vmem:[#allocation2] sm:$0x11] %v35_v26  ;;  %vm40_vm11 = vmand %vm30_vm2, %vm39_vm7  ;;  %v49_v30 = vsel %vm1894_vm9, 0, %v48_v24 }
   0xc   :  { %166 = vmatprep.subr.bf16.mxu0 %v1686_v7  ;;  %v271_v31 = vshll.u32 %v263_v25, 16  ;;  %v279_v33 = vshll.u32 %v264_v28, 16  ;;  %vm41_vm12 = vmor %vm40_vm11, %vm1894_vm9  ;;  %50 = vst [vmem:[#allocation3 + $0x8] sm:$0x1] %v49_v30  ;;  %v278_v37 = vrot.slane %v276_v32, 7  ;;  %v1702_v40 = vld [vmem:[%s2224_s4 + $0x40] sm:$0xff]  }
   0xd   :  { %v270_v34 = vrot.slane %v268_v29, 7  ;;  %v43_v35 = vsel %vm41_vm12, 0, %v42_v21  ;;  %vm1909_vm14 = vmor %vm28_vm1, %vm265_vm10  ;;  %v1703_v43 = vld [vmem:[%s2224_s4] sm:$0xff]   ;;  %v1704_v44 = vld [vmem:[%s2224_s4 + $0x48] sm:$0xff]   ;;  %v71_v54 = vshrl.u32 %v70_v53, 7  ;;  %vm217_vm1 = vcmask 130048  }
   0xe   :  { %44 = vst [vmem:[#allocation2 + $0x10] sm:$0x11] %v43_v35  ;;  %vm1917_vm0 = vmand %vm205_vm13, %vm37_vm5  ;;  %v281_v42 = vor.u32 %v279_v33, %v278_v37  ;;  %v1705_v46 = vld [vmem:[%s2224_s4 + $0x8] sm:$0xff]   ;;  %v283_v47 = vrot.slane %v278_v37, 4  ;;  %v1708_v50 = vld [vmem:[%s2224_s4 + $0x50] sm:$0xff]   ;;  %vm751_vm4 = vcmask 1046528  }
   0xf   :  { %167 = vmatpush1.bf16.msra.mxu0 %v1688_v8  ;;  %v274_v38 = vrot.slane %v270_v34, 4  ;;  %v273_v41 = vor.u32 %v271_v31, %v270_v34  ;;  %v72_v55 = vsub.s32 0, %v71_v54  ;;  %v76_v56 = vsub.s32 1, %v71_v54  ;;  %v68_v57 = vld [vmem:[%s2225_s6] ss:$4 sm:$0x3] }
  0x10   :  { %168 = vmatprep.subr.bf16.mxu0 %v1689_v9  ;;  %v1706_v5 = vld [vmem:[%s2224_s4 + $0xc0] sm:$0xff]   ;;  %v1709_v9 = vld [vmem:[%s2224_s4 + $0x10] sm:$0xff]   ;;  %v1718_v20 = vld [vmem:[%s2224_s4 + $0xd8] sm:$0xff]   ;;  %vm409_vm2 = vsmask.f32 7424 }
  0x11   :  { %v282_v45 = vsel %vm1909_vm14, %v274_v38, %v281_v42  ;;  %v73_v58 = vrot.slane %v68_v57, %v72_v55  ;;  %v77_v59 = vrot.slane %v68_v57, %v76_v56  ;;  %v1701_v7 = vld [vmem:[%s2223_s3] sm:$0xff]   ;;  %v1719_v21 = vld [vmem:[%s2224_s4 + $0x98] sm:$0xff]   ;;  %v1720_v22 = vld [vmem:[%s2224_s4 + $0x68] sm:$0xff]  }
  0x12   :  { %v289_v48 = vld [vmem:[#allocation2] sm:$0xf]  ;;  %292 = vst [vmem:[#allocation2 + $0x8] sm:$0xf] %v282_v45  ;;  %v1721_v23 = vld [vmem:[%s2224_s4 + $0x28] sm:$0xff]   ;;  %v1724_v26 = vld [vmem:[%s2224_s4 + $0x70] sm:$0xff]  }
  0x13   :  { %169 = vmatpush1.bf16.msra.mxu0 %v1691_v10  ;;  %v290_v49 = vsel %vm1917_vm0, %v273_v41, %v289_v48  ;;  %v1707_v8 = vld [vmem:[%s2224_s4 + $0x80] sm:$0xff]   ;;  %v1710_v10 = vld [vmem:[%s2224_s4 + $0xc8] sm:$0xff]   ;;  %v1725_v27 = vld [vmem:[%s2224_s4 + $0x30] sm:$0xff]  }
  0x14   :  { %170 = vmatprep.subr.bf16.mxu0 %v1692_v11  ;;  %291 = vst [vmem:[#allocation2] sm:$0xf] %v290_v49  ;;  %v1711_v11 = vld [vmem:[%s2224_s4 + $0x88] sm:$0xff]   ;;  %v1722_v24 = vld [vmem:[%s2224_s4 + $0xe0] sm:$0xff]   ;;  %v1728_v29 = vld [vmem:[%s2224_s4 + $0x78] sm:$0xff]  }
  0x15   :  { %v293_v51 = vld [vmem:[#allocation2 + $0x10] sm:$0x1]  ;;  %v1723_v25 = vld [vmem:[%s2224_s4 + $0xa0] sm:$0xff]   ;;  %v1726_v28 = vld [vmem:[%s2224_s4 + $0xe8] sm:$0xff]  }
  0x16   :  { %v294_v52 = vsel %vm1880_vm3, %v283_v47, %v293_v51  ;;  %v1727_v30 = vld [vmem:[%s2224_s4 + $0xa8] sm:$0xff]   ;;  %v1730_v31 = vld [vmem:[%s2224_s4 + $0xf0] sm:$0xff]   ;;  %v1729_v32 = vld [vmem:[%s2224_s4 + $0x38] sm:$0xff]  }
  0x17   :  { %171 = vmatpush1.bf16.msra.mxu0 %v1694_v12  ;;  %295 = vst [vmem:[#allocation2 + $0x10] sm:$0x1] %v294_v52  ;;  %v1712_v12 = vld [vmem:[%s2224_s4 + $0x58] sm:$0xff]   ;;  %v1731_v33 = vld [vmem:[%s2224_s4 + $0xb0] sm:$0xff]   ;;  %v1737_v37 = vld [vmem:[%s2224_s4 + $0x140] sm:$0xff]  }
  0x18   :  { %172 = vmatprep.subr.bf16.mxu0 %v1695_v13  ;;  %v1713_v13 = vld [vmem:[%s2224_s4 + $0x18] sm:$0xff]   ;;  %v321_v49 = vld [vmem:[#allocation2 + $0x4] sm:$0xf]  ;;  %v325_v53 = vld [vmem:[#allocation2 + $0x14] sm:$0x1] }
  0x19   :  { %v1734_v34 = vld [vmem:[%s2224_s4 + $0xf8] sm:$0xff]   ;;  %v1774_v36 = vld [vmem:[%s2226_s5 + $0x80] sm:$0xff]  }
  0x1a   :  { %v1735_v35 = vld [vmem:[%s2224_s4 + $0xb8] sm:$0xff]  }
  0x1b   :  { %173 = vmatpush1.bf16.msra.mxu0 %v1697_v14  ;;  %v1714_v14 = vld [vmem:[%s2224_s4 + $0xd0] sm:$0xff]  }
  0x1c   :  { %174 = vmatprep.subr.bf16.mxu0 %v1698_v15  ;;  %v1715_v15 = vld [vmem:[%s2224_s4 + $0x90] sm:$0xff]  }
  0x1f   :  { %175 = vmatpush1.bf16.msra.mxu0 %v1700_v16  ;;  %v1716_v16 = vld [vmem:[%s2224_s4 + $0x60] sm:$0xff]  }
  0x20   :  { %1537 = vmatprep.subr.bf16.mxu0 %v1702_v40 }
  0x22   :  { %193 = vmatmul.mubr.bf16.vlgmr.msra.gmra.mrb[0].mxu0 %v51_v17  ;;  %v1717_v17 = vld [vmem:[%s2224_s4 + $0x20] sm:$0xff]  }
  0x23   :  { %1538 = vmatpush3.bf16.msra.mxu0 %v1703_v43 }
  0x24   :  { %1539 = vmatprep.subr.bf16.mxu0 %v1704_v44 }
  0x27   :  { %1540 = vmatpush3.bf16.msra.mxu0 %v1705_v46 }
  0x28   :  { %1541 = vmatprep.subr.bf16.mxu0 %v1708_v50 }
  0x2b   :  { %1542 = vmatpush3.bf16.msra.mxu0 %v1709_v9 }
  0x2c   :  { %1543 = vmatprep.subr.bf16.mxu0 %v1712_v12 }
  0x2f   :  { %1544 = vmatpush3.bf16.msra.mxu0 %v1713_v13 }
  0x30   :  { %1545 = vmatprep.subr.bf16.mxu0 %v1716_v16 }
  0x33   :  { %1546 = vmatpush3.bf16.msra.mxu0 %v1717_v17 }
  0x34   :  { %1547 = vmatprep.subr.bf16.mxu0 %v1720_v22 }
  0x37   :  { %1548 = vmatpush3.bf16.msra.mxu0 %v1721_v23  ;;  %v1741_v23 = vld [vmem:[%s2224_s4 + $0x148] sm:$0xff]  }
  0x38   :  { %1549 = vmatprep.subr.bf16.mxu0 %v1724_v26  ;;  %v1742_v26 = vld [vmem:[%s2224_s4 + $0x108] sm:$0xff]  }
  0x3b   :  { %1550 = vmatpush3.bf16.msra.mxu0 %v1725_v27  ;;  %v1743_v27 = vld [vmem:[%s2224_s4 + $0x150] sm:$0xff]  }
  0x3c   :  { %1551 = vmatprep.subr.bf16.mxu0 %v1728_v29  ;;  %v1745_v29 = vld [vmem:[%s2224_s4 + $0x158] sm:$0xff]  }
  0x3f   :  { %1552 = vmatpush3.bf16.msra.mxu0 %v1729_v32  ;;  %v1748_v32 = vld [vmem:[%s2224_s4 + $0x120] sm:$0xff]  }
  0x40   :  { %1614 = vmatprep.subr.bf16.mxu0 %v1784_v18 }
  0xf5   :  { %v194_v60 = vpop.f32.mrb[0].mxu0 }
  0xf6   :  { %v196_v61 = vpop.f32.mrb[1].mxu0  ;;  %v195_v62 = vadd.f32 %v194_v60, %v73_v58 }
  0xf7   :  { %v197_v63 = vadd.f32 %v196_v61, %v77_v59  ;;  %v198_v0 = vpop.f32.mrb[2].mxu0 }
  0xf8   :  { %v199_v1 = vpop.f32.mrb[3].mxu0  ;;  %v201_v3 = vpack.c.bf16 %v195_v62, %v195_v62 }
  0xf9   :  { %v202_v2 = vpack.c.bf16 %v197_v63, %v197_v63 }
  0xfb   :  { %v204_v4 = vrot.slane %v202_v2, 4 }
  0xfd   :  { %v208_v6 = vsel %vm205_vm13, %v201_v3, %v204_v4 }
  0xfe   :  { %1609 = vmatpush3.bf16.msra.mxu1 %v208_v6 }
  0xff   :  { %1515 = vmatprep.subr.bf16.mxu1 %v1706_v5 }
 0x101   :  { %1611 = vmatmul.mubr.msk.bf16.vlgmr.msra.gmra.mrb[0].mxu1 %vm217_vm1, %v1701_v7 }
 0x102   :  { %1516 = vmatpush3.bf16.msra.mxu1 %v1707_v8 }
 0x103   :  { %1517 = vmatprep.subr.bf16.mxu1 %v1710_v10 }
 0x106   :  { %1518 = vmatpush3.bf16.msra.mxu1 %v1711_v11 }
 0x107   :  { %1519 = vmatprep.subr.bf16.mxu1 %v1714_v14 }
 0x10a   :  { %1520 = vmatpush3.bf16.msra.mxu1 %v1715_v15 }
 0x10b   :  { %1521 = vmatprep.subr.bf16.mxu1 %v1718_v20 }
 0x10e   :  { %1522 = vmatpush3.bf16.msra.mxu1 %v1719_v21  ;;  %v1739_v21 = vld [vmem:[%s2224_s4 + $0x100] sm:$0xff]  }
 0x10f   :  { %1523 = vmatprep.subr.bf16.mxu1 %v1722_v24 }
 0x112   :  { %1524 = vmatpush3.bf16.msra.mxu1 %v1723_v25 }
 0x113   :  { %1525 = vmatprep.subr.bf16.mxu1 %v1726_v28  ;;  %v1744_v28 = vld [vmem:[%s2224_s4 + $0x110] sm:$0xff]  }
 0x116   :  { %1526 = vmatpush3.bf16.msra.mxu1 %v1727_v30  ;;  %v1746_v30 = vld [vmem:[%s2224_s4 + $0x118] sm:$0xff]  }
 0x117   :  { %1527 = vmatprep.subr.bf16.mxu1 %v1730_v31  ;;  %v1747_v31 = vld [vmem:[%s2224_s4 + $0x160] sm:$0xff]  }
 0x11a   :  { %1528 = vmatpush3.bf16.msra.mxu1 %v1731_v33  ;;  %v1749_v33 = vld [vmem:[%s2224_s4 + $0x168] sm:$0xff]  }
 0x11b   :  { %1529 = vmatprep.subr.bf16.mxu1 %v1734_v34  ;;  %v1750_v34 = vld [vmem:[%s2224_s4 + $0x128] sm:$0xff]  }
 0x11e   :  { %1530 = vmatpush3.bf16.msra.mxu1 %v1735_v35  ;;  %v1751_v35 = vld [vmem:[%s2224_s4 + $0x170] sm:$0xff]  }
 0x11f   :  { %1559 = vmatprep.subr.bf16.mxu1 %v1737_v37  ;;  %v1752_v37 = vld [vmem:[%s2224_s4 + $0x130] sm:$0xff]  }
 0x1d4   :  { %v255_v38 = vpop.f32.mrb[0].mxu1 }
 0x1d5   :  { %v1509_v40 = vpack.c.bf16 %v255_v38, %v255_v38  ;;  %v1612_v41 = vpop.f32.mrb[1].mxu1  ;;  %v1753_v38 = vld [vmem:[%s2224_s4 + $0x178] sm:$0xff]  }
 0x1d6   :  { %v258_v42 = vpop.f32.mrb[2].mxu1  ;;  %v1754_v41 = vld [vmem:[%s2224_s4 + $0x138] sm:$0xff]  }
 0x1d7   :  { %v302_v43 = vshrl.u32 %v1509_v40, 16  ;;  %v1510_v44 = vpack.c.bf16 %v258_v42, %v258_v42  ;;  %v1613_v45 = vpop.f32.mrb[3].mxu1  ;;  %v305_v47 = vshll.u32 %v1509_v40, 16 }
 0x1d8   :  { %v1756_v45 = vld [vmem:[%s2226_s5] sm:$0xff]  }
 0x1d9   :  { %v304_v46 = vrot.slane %v302_v43, 7  ;;  %v310_v48 = vshrl.u32 %v1510_v44, 16  ;;  %v313_v52 = vshll.u32 %v1510_v44, 16 }
 0x1db   :  { %v307_v50 = vor.u32 %v305_v47, %v304_v46  ;;  %v312_v51 = vrot.slane %v310_v48, 7  ;;  %v308_v54 = vrot.slane %v304_v46, 4  ;;  %v1757_v46 = vld [vmem:[%s2226_s5 + $0x8] sm:$0xff]   ;;  %v1758_v47 = vld [vmem:[%s2226_s5 + $0x40] sm:$0xff]   ;;  %v1759_v48 = vld [vmem:[%s2226_s5 + $0x10] sm:$0xff]  }
 0x1dd   :  { %v322_v55 = vsel %vm1917_vm0, %v307_v50, %v321_v49  ;;  %v315_v56 = vor.u32 %v313_v52, %v312_v51  ;;  %v317_v57 = vrot.slane %v312_v51, 4  ;;  %v1760_v49 = vld [vmem:[%s2226_s5 + $0x48] sm:$0xff]   ;;  %v1761_v50 = vld [vmem:[%s2226_s5 + $0x18] sm:$0xff]   ;;  %v1762_v51 = vld [vmem:[%s2226_s5 + $0x50] sm:$0xff]  }
 0x1de   :  { %323 = vst [vmem:[#allocation2 + $0x4] sm:$0xf] %v322_v55  ;;  %v1763_v52 = vld [vmem:[%s2226_s5 + $0x20] sm:$0xff]  }
 0x1df   :  { %v316_v58 = vsel %vm1909_vm14, %v308_v54, %v315_v56  ;;  %v326_v59 = vsel %vm1880_vm3, %v317_v57, %v325_v53  ;;  %v1764_v53 = vld [vmem:[%s2226_s5 + $0x58] sm:$0xff]   ;;  %v1765_v54 = vld [vmem:[%s2226_s5 + $0x28] sm:$0xff]   ;;  %v1766_v55 = vld [vmem:[%s2226_s5 + $0x60] sm:$0xff]  }
 0x1e0   :  { %324 = vst [vmem:[#allocation2 + $0xc] sm:$0xf] %v316_v58  ;;  %327 = vst [vmem:[#allocation2 + $0x14] sm:$0x1] %v326_v59  ;;  %v1767_v56 = vld [vmem:[%s2226_s5 + $0x30] sm:$0xff]   ;;  %v1768_v57 = vld [vmem:[%s2226_s5 + $0x68] sm:$0xff]  }
 0x1e1   :  { %v1769_v58 = vld [vmem:[%s2226_s5 + $0x38] sm:$0xff]   ;;  %v1770_v59 = vld [vmem:[%s2226_s5 + $0x70] sm:$0xff]  }
 0x1e5   :  { %v328_v60 = vld [vmem:[#allocation2] sm:$0xff] }
 0x1e6   :  { %v712_v3 = vld [vmem:[#allocation2] sm:$0xee] }
 0x1e7   :  { %v2040_v61 = vld [vmem:[#allocation2 + $0x8] sm:$0xff]  ;;  %v362_v62 = vld [vmem:[#allocation2 + $0x10] sm:$0x11] }
 0x1e8   :  { %v1360_v63 = vcombine.low %v328_v60, %v2040_v61  ;;  %v1361_v0 = vcombine.high %v328_v60, %v2040_v61  ;;  %v1363_v1 = vcombine.high %v362_v62, %v362_v62  ;;  %v2044_v2 = vcombine.low %v362_v62, %v362_v62  ;;  %v1772_v60 = vld [vmem:[%s2226_s5 + $0x78] sm:$0xff]  }
 0x1e9   :  { %v1429_v6 = vcombine.high %v712_v3, %v2040_v61  ;;  %v1428_v40 = vcombine.low %v712_v3, %v2040_v61 }
 0x1ea   :  { %v425_v4 = vshll.u32 %v1361_v0, 16  ;;  %703 = vmatprep.mubr.bf16.mxu0 %v1361_v0  ;;  %v430_v5 = vshll.u32 %v1363_v1, 16  ;;  %v413_v7 = vshll.u32 %v1360_v63, 16  ;;  %v418_v8 = vshll.u32 %v2044_v2, 16 }
 0x1eb   :  { %704 = vmatmul.mubr.bf16.vlgmr.msra.gmra.mrb[4].mxu0 %v1360_v63  ;;  %v423_v9 = vshrl.u32 %v1361_v0, 16  ;;  %v411_v11 = vshrl.u32 %v1360_v63, 16  ;;  %v755_v15 = vrot.slane %v1429_v6, 1  ;;  %v756_v16 = vrot.slane %v1363_v1, 1 }
 0x1ec   :  { %v427_v10 = vrot.slane %v425_v4, 1  ;;  %1630 = vmatprep.mubr.msk.bf16.mxu0 %vm1785_vm15, %v1784_v18  ;;  %v415_v12 = vrot.slane %v413_v7, 1  ;;  %v432_v14 = vrot.slane %v430_v5, 1  ;;  %v420_v20 = vrot.slane %v418_v8, 1  ;;  %1615 = vmatpush3.bf16.msra.mxu0 %v1758_v47 }
 0x1ed   :  { %v757_v25 = vsel %vm751_vm4, %v755_v15, %v756_v16  ;;  %v752_v42 = vrot.slane %v1428_v40, 1  ;;  %v753_v43 = vrot.slane %v2044_v2, 1  ;;  %1616 = vmatprep.subr.bf16.mxu0 %v1784_v18  ;;  %v1446_v15 = vld [vmem:[%s2225_s6 + $0x1] ss:$0 sm:$0xff] }
 0x1ee   :  { %v428_v13 = vor.u32 %v427_v10, %v423_v9  ;;  %v416_v17 = vor.u32 %v415_v12, %v411_v11 }
 0x1ef   :  { %v754_v44 = vsel %vm751_vm4, %v752_v42, %v753_v43 }
 0x1f0   :  { %v433_v22 = vsel %vm409_vm2, %v428_v13, %v432_v14  ;;  %v421_v24 = vsel %vm409_vm2, %v416_v17, %v420_v20  ;;  %1617 = vmatpush3.bf16.msra.mxu0 %v1760_v49 }
 0x1f1   :  { %564 = vmatprep.mubr.bf16.mxu1 %v433_v22  ;;  %1618 = vmatprep.subr.bf16.mxu0 %v1784_v18 }
 0x1f2   :  { %565 = vmatmul.mubr.bf16.vlgmr.msra.gmra.mrb[4].mxu1 %v421_v24 }
 0x1f3   :  { %1560 = vmatpush3.bf16.msra.mxu1 %v1739_v21  ;;  %888 = vmatprep.mubr.bf16.mxu1 %v757_v25 }
 0x1f4   :  { %1561 = vmatprep.subr.bf16.mxu1 %v1741_v23  ;;  %1619 = vmatpush3.bf16.msra.mxu0 %v1762_v51 }
 0x1f5   :  { %1620 = vmatprep.subr.bf16.mxu0 %v1784_v18 }
 0x1f7   :  { %1562 = vmatpush3.bf16.msra.mxu1 %v1742_v26 }
 0x1f8   :  { %1563 = vmatprep.subr.bf16.mxu1 %v1743_v27  ;;  %1621 = vmatpush3.bf16.msra.mxu0 %v1764_v53 }
 0x1f9   :  { %1622 = vmatprep.subr.bf16.mxu0 %v1784_v18 }
 0x1fb   :  { %1564 = vmatpush3.bf16.msra.mxu1 %v1744_v28 }
 0x1fc   :  { %1565 = vmatprep.subr.bf16.mxu1 %v1745_v29  ;;  %1623 = vmatpush3.bf16.msra.mxu0 %v1766_v55  ;;  %v1776_v55 = vld [vmem:[%s2226_s5 + $0x90] sm:$0xff]  }
 0x1fd   :  { %1624 = vmatprep.subr.bf16.mxu0 %v1784_v18 }
 0x1ff   :  { %1566 = vmatpush3.bf16.msra.mxu1 %v1746_v30 }
 0x200   :  { %1567 = vmatprep.subr.bf16.mxu1 %v1747_v31  ;;  %1625 = vmatpush3.bf16.msra.mxu0 %v1768_v57  ;;  %v1778_v57 = vld [vmem:[%s2226_s5 + $0xa0] sm:$0xff]  }
 0x201   :  { %1626 = vmatprep.subr.bf16.mxu0 %v1784_v18 }
 0x203   :  { %1568 = vmatpush3.bf16.msra.mxu1 %v1748_v32  ;;  %v934_v32 = vld [vmem:[#allocation3] sm:$0xf] }
 0x204   :  { %1569 = vmatprep.subr.bf16.mxu1 %v1749_v33  ;;  %1627 = vmatpush3.bf16.msra.mxu0 %v1770_v59  ;;  %v1780_v59 = vld [vmem:[%s2226_s5 + $0xb0] sm:$0xff]  }
 0x205   :  { %1628 = vmatprep.subr.bf16.mxu0 %v1784_v18 }
 0x207   :  { %1570 = vmatpush3.bf16.msra.mxu1 %v1750_v34 }
 0x208   :  { %1571 = vmatprep.subr.bf16.mxu1 %v1751_v35  ;;  %1629 = vmatpush3.bf16.msra.mxu0 %v1772_v60 }
 0x209   :  { %1654 = vmatprep.subr.bf16.mxu0 %v1784_v18 }
 0x20b   :  { %1572 = vmatpush3.bf16.msra.mxu1 %v1752_v37  ;;  %v938_v37 = vld [vmem:[#allocation3 + $0x8] sm:$0x1] }
 0x20c   :  { %1573 = vmatprep.subr.bf16.mxu1 %v1753_v38 }
 0x20f   :  { %1574 = vmatpush3.bf16.msra.mxu1 %v1754_v41 }
 0x210   :  { %1634 = vmatprep.subr.bf16.mxu1 %v1784_v18 }
 0x212   :  { %889 = vmatmul.mubr.bf16.vlgmr.msra.gmra.mrb[8].mxu1 %v754_v44 }
 0x213   :  { %1650 = vmatprep.mubr.msk.bf16.mxu1 %vm1785_vm15, %v1784_v18  ;;  %1635 = vmatpush3.bf16.msra.mxu1 %v1756_v45 }
 0x214   :  { %1636 = vmatprep.subr.bf16.mxu1 %v1784_v18 }
 0x217   :  { %1637 = vmatpush3.bf16.msra.mxu1 %v1757_v46 }
 0x218   :  { %1638 = vmatprep.subr.bf16.mxu1 %v1784_v18 }
 0x21b   :  { %1639 = vmatpush3.bf16.msra.mxu1 %v1759_v48 }
 0x21c   :  { %1640 = vmatprep.subr.bf16.mxu1 %v1784_v18 }
 0x21f   :  { %1641 = vmatpush3.bf16.msra.mxu1 %v1761_v50 }
 0x220   :  { %1642 = vmatprep.subr.bf16.mxu1 %v1784_v18 }
 0x223   :  { %1643 = vmatpush3.bf16.msra.mxu1 %v1763_v52 }
 0x224   :  { %1644 = vmatprep.subr.bf16.mxu1 %v1784_v18 }
 0x227   :  { %1645 = vmatpush3.bf16.msra.mxu1 %v1765_v54  ;;  %v1775_v54 = vld [vmem:[%s2226_s5 + $0x88] sm:$0xff]  }
 0x228   :  { %1646 = vmatprep.subr.bf16.mxu1 %v1784_v18 }
 0x22b   :  { %1647 = vmatpush3.bf16.msra.mxu1 %v1767_v56  ;;  %v1777_v56 = vld [vmem:[%s2226_s5 + $0x98] sm:$0xff]  }
 0x22c   :  { %1648 = vmatprep.subr.bf16.mxu1 %v1784_v18 }
 0x22f   :  { %1649 = vmatpush3.bf16.msra.mxu1 %v1769_v58  ;;  %v1779_v58 = vld [vmem:[%s2226_s5 + $0xa8] sm:$0xff]  }
 0x2be   :  { %v1553_v61 = vpop.f32.mrb[4].mxu0 }
 0x2bf   :  { %v1554_v62 = vpop.f32.mrb[5].mxu0 }
 0x2c0   :  { %v1555_v63 = vadd.f32 %v1554_v62, %v1553_v61  ;;  %v1556_v0 = vpop.f32.mrb[6].mxu0  ;;  %v1781_v62 = vld [vmem:[%s2226_s5 + $0xb8] sm:$0xff]  }
 0x2c1   :  { %v1557_v1 = vpop.f32.mrb[7].mxu0 }
 0x2c2   :  { %v1558_v2 = vadd.f32 %v1557_v1, %v1556_v0 }
 0x2c5   :  { %v1531_v3 = vpop.f32.mrb[4].mxu1 }
 0x2c6   :  { %v1532_v4 = vpop.f32.mrb[5].mxu1 }
 0x2c7   :  { %v1533_v5 = vadd.f32 %v1532_v4, %v1531_v3  ;;  %v1534_v6 = vpop.f32.mrb[6].mxu1 }
 0x2c8   :  { %v1535_v7 = vpop.f32.mrb[7].mxu1 }
 0x2c9   :  { %v706_v8 = vadd.f32 %v1555_v63, %v1533_v5  ;;  %v1536_v9 = vadd.f32 %v1535_v7, %v1534_v6 }
 0x2cb   :  { %v709_v10 = vadd.f32 %v1558_v2, %v1536_v9 }
 0x2e5   :  { %v1575_v11 = vpop.f32.mrb[8].mxu1 }
 0x2e6   :  { %v1576_v12 = vpop.f32.mrb[9].mxu1 }
 0x2e7   :  { %v1577_v13 = vadd.f32 %v1576_v12, %v1575_v11  ;;  %v1578_v14 = vpop.f32.mrb[10].mxu1 }
 0x2e8   :  { %v1579_v16 = vpop.f32.mrb[11].mxu1 }
 0x2e9   :  { %v897_v17 = vadd.f32 %v1577_v13, %v706_v8  ;;  %v1580_v20 = vadd.f32 %v1579_v16, %v1578_v14 }
 0x2eb   :  { %v904_v21 = vadd.f32 %v1446_v15, %v897_v17  ;;  %v898_v22 = vadd.f32 %v1580_v20, %v709_v10 }
 0x2ed   :  { %v906_v23 = vmax.f32 %v904_v21, 0.0  ;;  %v905_v24 = vadd.f32 %v1446_v15, %v898_v22 }
 0x2ef   :  { %v1511_v25 = vpack.c.bf16 %v906_v23, %v906_v23  ;;  %v907_v26 = vmax.f32 %v905_v24, 0.0 }
 0x2f1   :  { %v915_v27 = vshrl.u32 %v1511_v25, 16  ;;  %v1512_v28 = vpack.c.bf16 %v907_v26, %v907_v26  ;;  %v918_v30 = vshll.u32 %v1511_v25, 16 }
 0x2f3   :  { %v917_v29 = vrot.slane %v915_v27, 7  ;;  %v923_v31 = vshrl.u32 %v1512_v28, 16  ;;  %v926_v35 = vshll.u32 %v1512_v28, 16 }
 0x2f5   :  { %v920_v33 = vor.u32 %v918_v30, %v917_v29  ;;  %v925_v34 = vrot.slane %v923_v31, 7  ;;  %v921_v38 = vrot.slane %v917_v29, 4 }
 0x2f7   :  { %v935_v40 = vsel %vm1917_vm0, %v920_v33, %v934_v32  ;;  %v928_v41 = vor.u32 %v926_v35, %v925_v34  ;;  %v930_v42 = vrot.slane %v925_v34, 4 }
 0x2f8   :  { %936 = vst [vmem:[#allocation3] sm:$0xf] %v935_v40 }
 0x2f9   :  { %v929_v43 = vsel %vm1909_vm14, %v921_v38, %v928_v41  ;;  %v939_v44 = vsel %vm1880_vm3, %v930_v42, %v938_v37 }
 0x2fa   :  { %937 = vst [vmem:[#allocation3 + $0x4] sm:$0xf] %v929_v43  ;;  %940 = vst [vmem:[#allocation3 + $0x8] sm:$0x1] %v939_v44 }
 0x2ff   :  { %v941_v45 = vld [vmem:[#allocation3] sm:$0xf] }
 0x300   :  { %v1177_v60 = vld [vmem:[#allocation3] sm:$0xe] }
 0x301   :  { %v942_v46 = vld [vmem:[#allocation3 + $0x4] sm:$0xf]  ;;  %v1773_v48 = vld [vmem:[#allocation3 + $0x8] ss:$0 sps:$4 sm:$0x11]  }
 0x302   :  { %v1465_v47 = vcombine.low %v941_v45, %v942_v46  ;;  %v993_v50 = vshll.u32 %v1773_v48, 16  ;;  %v1499_v61 = vcombine.low %v1177_v60, %v942_v46  ;;  %v1199_v0 = vrot.slane %v1773_v48, 1 }
 0x304   :  { %1651 = vmatmul.mubr.bf16.vlgmr.msra.gmra.mrb[12].mxu1 %v1465_v47  ;;  %v988_v49 = vshll.u32 %v1465_v47, 16  ;;  %v986_v39 = vshrl.u32 %v1465_v47, 16  ;;  %v995_v53 = vrot.slane %v993_v50, 1  ;;  %v1198_v63 = vrot.slane %v1499_v61, 1 }
 0x306   :  { %v990_v51 = vrot.slane %v988_v49, 1  ;;  %v1200_v1 = vsel %vm751_vm4, %v1198_v63, %v1199_v0 }
 0x308   :  { %v991_v52 = vor.u32 %v990_v51, %v986_v39 }
 0x30a   :  { %v996_v19 = vsel %vm409_vm2, %v991_v52, %v995_v53 }
 0x30b   :  { %1631 = vmatmul.mubr.bf16.vlgmr.msra.gmra.mrb[8].mxu0 %v996_v19 }
 0x30c   :  { %1655 = vmatpush3.bf16.msra.mxu0 %v1774_v36  ;;  %1670 = vmatprep.mubr.msk.bf16.mxu0 %vm1785_vm15, %v1784_v18 }
 0x30d   :  { %1656 = vmatprep.subr.bf16.mxu0 %v1784_v18 }
 0x310   :  { %1657 = vmatpush3.bf16.msra.mxu0 %v1775_v54 }
 0x311   :  { %1658 = vmatprep.subr.bf16.mxu0 %v1784_v18 }
 0x314   :  { %1659 = vmatpush3.bf16.msra.mxu0 %v1776_v55 }
 0x315   :  { %1660 = vmatprep.subr.bf16.mxu0 %v1784_v18 }
 0x318   :  { %1661 = vmatpush3.bf16.msra.mxu0 %v1777_v56 }
 0x319   :  { %1662 = vmatprep.subr.bf16.mxu0 %v1784_v18 }
 0x31c   :  { %1663 = vmatpush3.bf16.msra.mxu0 %v1778_v57 }
 0x31d   :  { %1664 = vmatprep.subr.bf16.mxu0 %v1784_v18 }
 0x320   :  { %1665 = vmatpush3.bf16.msra.mxu0 %v1779_v58 }
 0x321   :  { %1666 = vmatprep.subr.bf16.mxu0 %v1784_v18 }
 0x324   :  { %1667 = vmatpush3.bf16.msra.mxu0 %v1780_v59 }
 0x325   :  { %1668 = vmatprep.subr.bf16.mxu0 %v1784_v18  ;;  %v1508_v18 = vld [vmem:[%s2225_s6 + $0x2] ss:$0 sm:$0xff] }
 0x328   :  { %1669 = vmatpush3.bf16.msra.mxu0 %v1781_v62 }
 0x32b   :  { %1671 = vmatmul.mubr.bf16.vlgmr.msra.gmra.mrb[12].mxu0 %v1200_v1 }
 0x3d7   :  { %v1170_v2 = vpop.f32.mrb[12].mxu1 }
 0x3d8   :  { %v1652_v3 = vpop.f32.mrb[13].mxu1 }
 0x3d9   :  { %v1173_v4 = vpop.f32.mrb[14].mxu1 }
 0x3da   :  { %v1653_v5 = vpop.f32.mrb[15].mxu1 }
 0x3de   :  { %v1080_v6 = vpop.f32.mrb[8].mxu0 }
 0x3df   :  { %v1171_v7 = vadd.f32 %v1170_v2, %v1080_v6  ;;  %v1632_v8 = vpop.f32.mrb[9].mxu0 }
 0x3e0   :  { %v1083_v9 = vpop.f32.mrb[10].mxu0 }
 0x3e1   :  { %v1174_v10 = vadd.f32 %v1173_v4, %v1083_v9  ;;  %v1633_v11 = vpop.f32.mrb[11].mxu0 }
 0x3fe   :  { %v1284_v12 = vpop.f32.mrb[12].mxu0 }
 0x3ff   :  { %v1291_v13 = vadd.f32 %v1284_v12, %v1171_v7  ;;  %v1672_v14 = vpop.f32.mrb[13].mxu0 }
 0x400   :  { %v1287_v15 = vpop.f32.mrb[14].mxu0 }
 0x401   :  { %v1298_v16 = vadd.f32 %v1508_v18, %v1291_v13  ;;  %v1292_v17 = vadd.f32 %v1287_v15, %v1174_v10  ;;  %v1673_v20 = vpop.f32.mrb[15].mxu0 }
 0x403   :  { %v1300_v21 = vmax.f32 %v1298_v16, 0.0  ;;  %v1299_v22 = vadd.f32 %v1508_v18, %v1292_v17 }
 0x405   :  { %1302 = vst [vmem:[%s2227_s7] sm:$0xff] %v1300_v21  ;;  %v1301_v23 = vmax.f32 %v1299_v22, 0.0 }
 0x407   :  { %1303 = vst [vmem:[%s2227_s7 + $0x8] sm:$0xff] %v1301_v23 }

</bundles_post_ra>
